<compile_context>
chip_gen: v5e
topology: v5e:2x2
jax: 0.10.0
libtpu: 0.0.40
codegen_flags: <defaults>
</compile_context>

<pallas_src>
import functools

import jax
import jax.numpy as jnp
import numpy as np
from jax import lax
from jax.experimental import pallas as pl
from jax.experimental.pallas import tpu as pltpu


# --------------------------------------------------------------------------------------
# Helpers
# --------------------------------------------------------------------------------------
def _round_up(x, m):
    return ((x + m - 1) // m) * m


def _sublane_granularity(dtype):
    # f32 packs 8 rows per vreg sublane group, 16-bit dtypes pack 16.
    return 16 if np.dtype(dtype).itemsize == 2 else 8


def _vmem_capacity_bytes():
    """Physical VMEM of this generation; conservative (v7x) fallback if the query fails."""
    try:
        info = pltpu.get_tpu_info()
        v = getattr(info, "vmem_capacity_bytes", None)
        if v:
            return int(v)
    except Exception:
        pass
    return 64 * 1024 * 1024


def _num_tensorcores():
    # TODO(synk): no stable public API for TCs-per-chip; best-effort attribute probe,
    # defaults to 1 (keeps behavior identical to single-TC chips when detection fails).
    try:
        info = pltpu.get_tpu_info()
        for attr in ("num_cores", "core_count", "num_tensorcores", "tensorcore_count"):
            v = getattr(info, attr, None)
            if v:
                return int(v)
    except Exception:
        pass
    return 1


def _pack_level_params(w, b, c_in_p, c_out_p, dtype):
    """PyTorch Conv1d weight [C_out, C_in, K] -> [C_out_p, K*C_in_p] (tap-major columns),
    zero-padded channels.  Bias -> [C_out_p, 1] kept in f32 for the epilogue add."""
    c_out, c_in, k = w.shape
    wt = jnp.transpose(w, (0, 2, 1))                              # [C_out, K, C_in]
    wp = jnp.zeros((c_out_p, k, c_in_p), dtype)
    wp = wp.at[:c_out, :, :c_in].set(wt.astype(dtype))
    wp = wp.reshape(c_out_p, k * c_in_p)
    bp = jnp.zeros((c_out_p, 1), jnp.float32).at[:c_out, 0].set(b.astype(jnp.float32))
    return wp, bp


def _compiler_params(dim_sems, est_vmem_bytes):
    kw = dict(dimension_semantics=dim_sems)
    # Only raise the scoped-VMEM ceiling when the blocks are actually big; the cap is
    # derived from physical VMEM so it is generation-aware (v7x 64 MiB vs v5e/v6e 128 MiB).
    if est_vmem_bytes > 8 * 1024 * 1024:
        cap = int(0.75 * _vmem_capacity_bytes())
        kw["vmem_limit_bytes"] = int(min(max(int(1.5 * est_vmem_bytes),
                                             32 * 1024 * 1024), cap))
    return pltpu.CompilerParams(**kw)


def _fused_plan(B, c0, L, params, K, dtype):
    """Slab / block layout + complete VMEM estimate for the fused path (used by both the
    fused wrapper and the mode='auto' crossover decision)."""
    n = len(params)
    gran = _sublane_granularity(dtype)
    dils = [2 ** i for i in range(n)]
    pads = [(K - 1) * d for d in dils]
    c_ins = [c0] + [w.shape[0] for (w, _) in params[:-1]]
    c_outs = [w.shape[0] for (w, _) in params]
    c_ins_p = [_round_up(c, gran) for c in c_ins]
    c_outs_p = [_round_up(c, gran) for c in c_outs]

    l_outs, cur = [], L
    for p in pads:
        cur += p
        l_outs.append(cur)
    l_final = l_outs[-1]
    out_cols = _round_up(l_final, 128)

    # Every intermediate activation is written at the same 128-aligned column a_col; the
    # next level reads its halo at a_col - pad (unaligned read, cheap).
    a_col = _round_up(max(pads), 128) if n > 1 else 0
    l_slab = _round_up(a_col + l_final, 128) if n > 1 else 128
    c_scr = max(c_outs_p[:-1]) if n > 1 else gran
    # Level-0 input window: [left pad | data | right pad], lane-dense (review: shrink xp).
    w_x = _round_up(L + 2 * pads[0], 128)

    esize = np.dtype(dtype).itemsize
    est = (2 * c_scr * l_slab                       # two ping-pong slabs
           + 2 * c_ins_p[0] * w_x                   # double-buffered input block
           + 2 * c_outs_p[-1] * out_cols) * esize   # double-buffered output block
    est += sum(c_outs_p[i] * K * c_ins_p[i] for i in range(n)) * esize
    est += sum(c_outs_p) * 4

    return dict(dils=dils, pads=pads, c_ins=c_ins, c_outs=c_outs, c_ins_p=c_ins_p,
                c_outs_p=c_outs_p, l_outs=l_outs, l_final=l_final, out_cols=out_cols,
                a_col=a_col, l_slab=l_slab, c_scr=c_scr, w_x=w_x, est_bytes=est)


# --------------------------------------------------------------------------------------
# Path 1: fully fused TCN (all levels in one pallas_call, activations resident in VMEM)
# --------------------------------------------------------------------------------------
def _tcn_fused_kernel(*refs, levels, a_col, kernel_size):
    """All TCN levels for one batch element.

    refs = (x, w_0..w_{n-1}, b_0..b_{n-1}, out, slab_a, slab_b)
    levels[i] = (c_in_p, c_out_p, dilation, pad_i, l_out_i, pad_next)

    Level-i activation lives at slab columns [a_col, a_col + l_out_i) of slab i%2.  Only
    the halo strips the next level reads (width pad_next on each side, left strip rounded
    to a 128-aligned start) are zeroed before the lane-aligned activation store.
    All in-kernel shifted slices act on VMEM/vregs only -- they never touch HBM.
    """
    n = len(levels)
    x_ref = refs[0]
    w_refs = refs[1:1 + n]
    b_refs = refs[1 + n:1 + 2 * n]
    o_ref = refs[1 + 2 * n]
    slabs = (refs[2 + 2 * n], refs[3 + 2 * n])
    K = kernel_size

    for i, (c_in_p, c_out_p, dil, pad, l_out, pad_next) in enumerate(levels):
        if i == 0:
            src = None
            base = 0                       # input window already includes the left pad
        else:
            src = slabs[(i - 1) % 2]
            base = a_col - pad             # unaligned read offset (XLU-side, cheap)

        w_full = w_refs[i][...]            # [c_out_p, K*c_in_p], tap-major columns
        acc = None
        for k in range(K):                 # K accumulated dots -- no [K*C_in, L] temporary
            col = base + k * dil
            if i == 0:
                tap = x_ref[0, :, pl.ds(col, l_out)]
            else:
                tap = src[pl.ds(0, c_in_p), pl.ds(col, l_out)]
            w_k = w_full[:, k * c_in_p:(k + 1) * c_in_p]
            d = jnp.dot(w_k, tap, preferred_element_type=jnp.float32)
            acc = d if acc is None else acc + d
        y = jnp.maximum(acc + b_refs[i][...], 0.0)        # bias + ReLU epilogue in f32

        if i == n - 1:
            # Single store; the lane tail [l_final, out_cols) is sliced off by the wrapper.
            o_ref[0, :, pl.ds(0, l_out)] = y.astype(o_ref.dtype)
        else:
            dst = slabs[i % 2]
            # Zero only the halo strips the next level reads (review item #1).
            pz = _round_up(pad_next, 128)                 # left strip: 128-aligned start/end
            dst[pl.ds(0, c_out_p), pl.ds(a_col - pz, pz)] = (
                jnp.zeros((c_out_p, pz), dst.dtype))
            dst[pl.ds(0, c_out_p), pl.ds(a_col + l_out, pad_next)] = (
                jnp.zeros((c_out_p, pad_next), dst.dtype))
            # Lane-aligned activation store (a_col is a multiple of 128 -> unmasked vst).
            dst[pl.ds(0, c_out_p), pl.ds(a_col, l_out)] = y.astype(dst.dtype)


def temporal_conv_net_fused(x, params, kernel_size, *, dtype=jnp.float32, interpret=False):
    B, c0, L = x.shape
    n = len(params)
    K = kernel_size
    plan = _fused_plan(B, c0, L, params, K, dtype)
    (dils, pads, c_ins_p, c_outs_p, l_outs) = (plan["dils"], plan["pads"],
                                               plan["c_ins_p"], plan["c_outs_p"],
                                               plan["l_outs"])
    a_col, l_slab, c_scr, w_x, out_cols = (plan["a_col"], plan["l_slab"], plan["c_scr"],
                                           plan["w_x"], plan["out_cols"])
    l_final, c_outs = plan["l_final"], plan["c_outs"]

    # Host-side packing: channel-padded input placed after pads[0] zero columns.
    xp = jnp.zeros((B, c_ins_p[0], w_x), dtype)
    xp = xp.at[:, :c0, pads[0]:pads[0] + L].set(x.astype(dtype))
    wps, bps = [], []
    for i, (w, b) in enumerate(params):
        wp, bp = _pack_level_params(w, b, c_ins_p[i], c_outs_p[i], dtype)
        wps.append(wp)
        bps.append(bp)

    levels = tuple((c_ins_p[i], c_outs_p[i], dils[i], pads[i], l_outs[i],
                    pads[i + 1] if i + 1 < n else 0) for i in range(n))
    kernel = functools.partial(_tcn_fused_kernel, levels=levels, a_col=a_col,
                               kernel_size=K)

    in_specs = [pl.BlockSpec((1, c_ins_p[0], w_x), lambda b_: (b_, 0, 0))]
    in_specs += [pl.BlockSpec(wp.shape, lambda b_: (0, 0)) for wp in wps]
    in_specs += [pl.BlockSpec(bp.shape, lambda b_: (0, 0)) for bp in bps]

    out_p = pl.pallas_call(
        kernel,
        out_shape=jax.ShapeDtypeStruct((B, c_outs_p[-1], out_cols), dtype),
        grid=(B,),
        in_specs=in_specs,
        out_specs=pl.BlockSpec((1, c_outs_p[-1], out_cols), lambda b_: (b_, 0, 0)),
        scratch_shapes=[pltpu.VMEM((c_scr, l_slab), dtype),
                        pltpu.VMEM((c_scr, l_slab), dtype)],
        compiler_params=_compiler_params(("parallel",), plan["est_bytes"]),
        interpret=interpret,
    )(xp, *wps, *bps)

    return out_p[:, :c_outs[-1], :l_final]


# --------------------------------------------------------------------------------------
# Path 2: per-level length-tiled kernel (bounded VMEM, grid over (batch, length-tiles))
# --------------------------------------------------------------------------------------
def _conv1d_relu_tile_kernel(xa_ref, xh_ref, w_ref, b_ref, o_ref, *, K, dilation,
                             c_in_p, tl):
    # xa_ref: [1, C_in_p, TL]  length tile j of the zero-padded input
    # xh_ref: [1, C_in_p, HL]  right halo (the HL columns after the tile)
    # w_ref:  [C_out_p, K*C_in_p], b_ref: [C_out_p, 1] (f32), o_ref: [1, C_out_p, TL]
    window = jnp.concatenate([xa_ref[0, :, :], xh_ref[0, :, :]], axis=-1)  # [C_in_p, TL+HL]
    w_full = w_ref[...]
    acc = None
    for k in range(K):                       # per-tap accumulated dots, no [K*C_in, TL] temp
        tap = window[:, k * dilation:k * dilation + tl]
        w_k = w_full[:, k * c_in_p:(k + 1) * c_in_p]
        d = jnp.dot(w_k, tap, preferred_element_type=jnp.float32)
        acc = d if acc is None else acc + d
    o_ref[0, :, :] = jnp.maximum(acc + b_ref[...], 0.0).astype(o_ref.dtype)


def dilated_conv1d_relu_tiled(x, w, b, dilation, *, tile_l=1024, dtype=jnp.float32,
                              interpret=False):
    """One TCN level: Conv1d(padding=(K-1)*dilation, dilation) + ReLU, tiled along length."""
    B, c_in, L = x.shape
    c_out, _, K = w.shape
    gran = _sublane_granularity(dtype)
    pad = (K - 1) * dilation
    l_out = L + pad                                   # symmetric padding, no chomp
    c_in_p = _round_up(c_in, gran)
    c_out_p = _round_up(c_out, gran)

    hl = max(_round_up(pad, 128), 128)                # lane-dense halo block
    tl = _round_up(max(_round_up(tile_l, 128), hl), hl)   # tl % hl == 0 (Blocked halo map)
    l_out_p = _round_up(l_out, tl)                    # lane-dense output tiles
    n_t = l_out_p // tl
    ratio = tl // hl

    # Zero-padded input: xm[:, c, u] = Xsym[c, u] where Xsym is x padded by `pad` zeros on
    # each side.  Only hl extra all-zero columns are appended to supply the last halo, and
    # each input column is read at most 1 + hl/tl times (review: halo-only second stream).
    xm = jnp.zeros((B, c_in_p, l_out_p + hl), dtype)
    xm = xm.at[:, :c_in, pad:pad + L].set(x.astype(dtype))
    wp, bp = _pack_level_params(w, b, c_in_p, c_out_p, dtype)

    kernel = functools.partial(_conv1d_relu_tile_kernel, K=K, dilation=dilation,
                               c_in_p=c_in_p, tl=tl)
    esize = np.dtype(dtype).itemsize
    est = 2 * esize * (c_in_p * (tl + hl) + c_out_p * tl)
    est += int(wp.size) * esize + int(bp.size) * 4

    out_p = pl.pallas_call(
        kernel,
        out_shape=jax.ShapeDtypeStruct((B, c_out_p, l_out_p), dtype),
        grid=(B, n_t),
        in_specs=[
            pl.BlockSpec((1, c_in_p, tl), lambda bb, j: (bb, 0, j)),
            pl.BlockSpec((1, c_in_p, hl), lambda bb, j: (bb, 0, (j + 1) * ratio)),
            pl.BlockSpec(wp.shape, lambda bb, j: (0, 0)),
            pl.BlockSpec(bp.shape, lambda bb, j: (0, 0)),
        ],
        out_specs=pl.BlockSpec((1, c_out_p, tl), lambda bb, j: (bb, 0, j)),
        compiler_params=_compiler_params(("parallel", "parallel"), est),
        interpret=interpret,
    )(xm, xm, wp, bp)

    return out_p[:, :c_out, :l_out]


# --------------------------------------------------------------------------------------
# Public forward pass + pure-JAX reference + parameter init
# --------------------------------------------------------------------------------------
def temporal_conv_net(x, params, kernel_size, *, dtype=jnp.float32, mode="auto",
                      tile_l=1024, interpret=False):
    """Forward pass matching the PyTorch TemporalConvNet (Dropout(p=0.0) == identity)."""
    if mode == "auto":
        plan = _fused_plan(x.shape[0], x.shape[1], x.shape[2], params, kernel_size, dtype)
        budget = int(0.4 * _vmem_capacity_bytes())        # generation-aware crossover
        use_fused = plan["est_bytes"] <= budget
        if use_fused and x.shape[0] == 1 and _num_tensorcores() >= 2:
            # v7x: grid=(1,) idles the second TensorCore; long sequences get better
            # utilisation from the (B, n_tiles) grid of the tiled path.
            if plan["l_final"] >= 4 * max(tile_l, 1024):
                use_fused = False
        mode = "fused" if use_fused else "tiled"

    if mode == "fused":
        return temporal_conv_net_fused(x, params, kernel_size, dtype=dtype,
                                       interpret=interpret)

    # Per-level tiled path.
    # TODO(synk): fuse groups of 2-3 consecutive levels per pallas_call (halo = sum of the
    # group's pads) to cut inter-level HBM round trips for very long sequences.
    h = x
    for i, (w, b) in enumerate(params):
        h = dilated_conv1d_relu_tiled(h, w, b, 2 ** i, tile_l=tile_l, dtype=dtype,
                                      interpret=interpret)
    return h


def temporal_conv_net_ref(x, params, kernel_size):
    """Pure-JAX reference (lax.conv_general_dilated) for validation."""
    h = x
    for i, (w, b) in enumerate(params):
        dilation = 2 ** i
        pad = (kernel_size - 1) * dilation
        y = lax.conv_general_dilated(
            h, w, window_strides=(1,), padding=[(pad, pad)], rhs_dilation=(dilation,),
            dimension_numbers=("NCH", "OIH", "NCH"))
        y = y + b.reshape(1, -1, 1)
        h = jnp.maximum(y, 0.0)
    return h


def init_tcn_params(key, num_inputs, num_channels, kernel_size):
    """Deterministic parameter init (Conv1d-style uniform bound)."""
    params = []
    in_ch = num_inputs
    for out_ch in num_channels:
        key, kw, kb = jax.random.split(key, 3)
        fan_in = in_ch * kernel_size
        bound = 1.0 / np.sqrt(fan_in)
        w = jax.random.uniform(kw, (out_ch, in_ch, kernel_size),
                               minval=-bound, maxval=bound, dtype=jnp.float32)
        b = jax.random.uniform(kb, (out_ch,), minval=-bound, maxval=bound,
                               dtype=jnp.float32)
        params.append((w, b))
        in_ch = out_ch
    return params


# --------------------------------------------------------------------------------------
if __name__ == "__main__":
    key = jax.random.PRNGKey(0)
    k_in, k_in2, k_params = jax.random.split(key, 3)

    batch, num_inputs, seq_len = 2, 4, 16
    num_channels = [8, 16]
    kernel_size = 2

    x = jax.random.normal(k_in, (batch, num_inputs, seq_len), dtype=jnp.float32)
    params = init_tcn_params(k_params, num_inputs, num_channels, kernel_size)
    ref = jax.block_until_ready(temporal_conv_net_ref(x, params, kernel_size))

    # 1) Fused path (one pallas_call, activations resident in VMEM).
    out_fused = jax.block_until_ready(
        temporal_conv_net(x, params, kernel_size, mode="fused"))
    assert out_fused.shape == ref.shape, (out_fused.shape, ref.shape)
    np.testing.assert_allclose(np.asarray(out_fused), np.asarray(ref), rtol=1e-5, atol=1e-5)

    # 2) Auto mode (generation-aware VMEM crossover) should pick an equivalent path.
    out_auto = jax.block_until_ready(
        temporal_conv_net(x, params, kernel_size, mode="auto"))
    np.testing.assert_allclose(np.asarray(out_auto), np.asarray(ref), rtol=1e-5, atol=1e-5)

    # 3) Per-level L-tiled path (long sequences): exercised with >1 length tiles and the
    #    halo-only second input stream.
    seq_len_long = 300
    x_long = jax.random.normal(k_in2, (batch, num_inputs, seq_len_long), dtype=jnp.float32)
    ref_long = jax.block_until_ready(temporal_conv_net_ref(x_long, params, kernel_size))
    out_tiled = jax.block_until_ready(
        temporal_conv_net(x_long, params, kernel_size, mode="tiled", tile_l=128))
    assert out_tiled.shape == ref_long.shape, (out_tiled.shape, ref_long.shape)
    np.testing.assert_allclose(np.asarray(out_tiled), np.asarray(ref_long),
                               rtol=1e-5, atol=1e-5)

    # 4) bf16 storage/DMA dtype (HBM/VMEM-bytes optimization); accumulation stays f32.
    out_bf16 = jax.block_until_ready(
        temporal_conv_net(x, params, kernel_size, mode="fused", dtype=jnp.bfloat16))
    np.testing.assert_allclose(np.asarray(out_bf16.astype(jnp.float32)), np.asarray(ref),
                               rtol=1e-1, atol=1e-1)

    print("KERNEL_OK")
</pallas_src>

<mosaic_0001>
module attributes {stable_mosaic.version = 11 : i64} {
  func.func @_tcn_fused_kernel(%arg0: i32, %arg1: memref<1x8x128xf32, #tpu.memory_space<vmem>>, %arg2: memref<8x16xf32, #tpu.memory_space<vmem>>, %arg3: memref<16x16xf32, #tpu.memory_space<vmem>>, %arg4: memref<8x1xf32, #tpu.memory_space<vmem>>, %arg5: memref<16x1xf32, #tpu.memory_space<vmem>>, %arg6: memref<1x16x128xf32, #tpu.memory_space<vmem>>, %arg7: memref<8x256xf32, #tpu.memory_space<vmem>>, %arg8: memref<8x256xf32, #tpu.memory_space<vmem>>) attributes {dimension_semantics = [#tpu.dimension_semantics<parallel>], iteration_bounds = array<i64: 2>, scalar_prefetch = 0 : i64, scratch_operands = 2 : i64, tpu.core_type = #tpu.core_type<tc>, window_params = [{transform_indices = @transform_0, window_bounds = array<i64: 1, 8, 128>}, {pipeline_mode = #tpu.pipeline_mode<synchronous>, transform_indices = @transform_1, window_bounds = array<i64: 8, 16>}, {pipeline_mode = #tpu.pipeline_mode<synchronous>, transform_indices = @transform_2, window_bounds = array<i64: 16, 16>}, {pipeline_mode = #tpu.pipeline_mode<synchronous>, transform_indices = @transform_3, window_bounds = array<i64: 8, 1>}, {pipeline_mode = #tpu.pipeline_mode<synchronous>, transform_indices = @transform_4, window_bounds = array<i64: 16, 1>}, {transform_indices = @transform_5, window_bounds = array<i64: 1, 16, 128>}]} {
    %c0 = arith.constant 0 : index
    %c0_0 = arith.constant 0 : index
    %0 = vector.load %arg2[%c0, %c0_0] : memref<8x16xf32, #tpu.memory_space<vmem>>, vector<8x16xf32>
    %c0_1 = arith.constant 0 : index
    %c0_2 = arith.constant 0 : index
    %c0_3 = arith.constant 0 : index
    %1 = vector.load %arg1[%c0_1, %c0_2, %c0_3] : memref<1x8x128xf32, #tpu.memory_space<vmem>>, vector<1x8x17xf32>
    %2 = vector.shape_cast %1 : vector<1x8x17xf32> to vector<8x17xf32>
    %3 = vector.extract_strided_slice %0 {offsets = [0, 0], sizes = [8, 8], strides = [1, 1]} : vector<8x16xf32> to vector<8x8xf32>
    %cst = arith.constant dense<0.000000e+00> : vector<8x17xf32>
    %4 = tpu.matmul %3, %2, %cst {dimension_numbers = #tpu.dot_dimension_numbers<[1], [0], [0], [1], [0, 0, 1, 1], [], []>} : vector<8x8xf32>, vector<8x17xf32>, vector<8x17xf32> -> vector<8x17xf32>
    %c0_4 = arith.constant 0 : index
    %c0_5 = arith.constant 0 : index
    %c1 = arith.constant 1 : index
    %5 = vector.load %arg1[%c0_4, %c0_5, %c1] : memref<1x8x128xf32, #tpu.memory_space<vmem>>, vector<1x8x17xf32>
    %6 = vector.shape_cast %5 : vector<1x8x17xf32> to vector<8x17xf32>
    %7 = vector.extract_strided_slice %0 {offsets = [0, 8], sizes = [8, 8], strides = [1, 1]} : vector<8x16xf32> to vector<8x8xf32>
    %cst_6 = arith.constant dense<0.000000e+00> : vector<8x17xf32>
    %8 = tpu.matmul %7, %6, %cst_6 {dimension_numbers = #tpu.dot_dimension_numbers<[1], [0], [0], [1], [0, 0, 1, 1], [], []>} : vector<8x8xf32>, vector<8x17xf32>, vector<8x17xf32> -> vector<8x17xf32>
    %9 = arith.addf %4, %8 : vector<8x17xf32>
    %c0_7 = arith.constant 0 : index
    %c0_8 = arith.constant 0 : index
    %10 = vector.load %arg4[%c0_7, %c0_8] : memref<8x1xf32, #tpu.memory_space<vmem>>, vector<8x1xf32>
    %11 = vector.broadcast %10 : vector<8x1xf32> to vector<8x17xf32>
    %12 = arith.addf %9, %11 : vector<8x17xf32>
    %cst_9 = arith.constant 0.000000e+00 : f32
    %13 = vector.broadcast %cst_9 : f32 to vector<8x17xf32>
    %14 = arith.maximumf %12, %13 : vector<8x17xf32>
    %cst_10 = arith.constant 0.000000e+00 : f32
    %15 = vector.broadcast %cst_10 : f32 to vector<8x128xf32>
    %c0_11 = arith.constant 0 : index
    %c0_12 = arith.constant 0 : index
    %16 = vector.load %arg7[%c0_11, %c0_12] : memref<8x256xf32, #tpu.memory_space<vmem>>, vector<8x128xf32>
    tpu.vector_store %arg7[%c0_11, %c0_12], %15 {strides = array<i32>} : memref<8x256xf32, #tpu.memory_space<vmem>>, vector<8x128xf32>,
    %cst_13 = arith.constant 0.000000e+00 : f32
    %17 = vector.broadcast %cst_13 : f32 to vector<8x2xf32>
    %c0_14 = arith.constant 0 : index
    %c145 = arith.constant 145 : index
    %18 = vector.load %arg7[%c0_14, %c145] : memref<8x256xf32, #tpu.memory_space<vmem>>, vector<8x2xf32>
    tpu.vector_store %arg7[%c0_14, %c145], %17 {strides = array<i32>} : memref<8x256xf32, #tpu.memory_space<vmem>>, vector<8x2xf32>,
    %c0_15 = arith.constant 0 : index
    %c128 = arith.constant 128 : index
    %19 = vector.load %arg7[%c0_15, %c128] : memref<8x256xf32, #tpu.memory_space<vmem>>, vector<8x17xf32>
    tpu.vector_store %arg7[%c0_15, %c128], %14 {strides = array<i32>} : memref<8x256xf32, #tpu.memory_space<vmem>>, vector<8x17xf32>,
    %c0_16 = arith.constant 0 : index
    %c0_17 = arith.constant 0 : index
    %20 = vector.load %arg3[%c0_16, %c0_17] : memref<16x16xf32, #tpu.memory_space<vmem>>, vector<16x16xf32>
    %c0_18 = arith.constant 0 : index
    %c126 = arith.constant 126 : index
    %21 = vector.load %arg7[%c0_18, %c126] : memref<8x256xf32, #tpu.memory_space<vmem>>, vector<8x19xf32>
    %22 = vector.extract_strided_slice %20 {offsets = [0, 0], sizes = [16, 8], strides = [1, 1]} : vector<16x16xf32> to vector<16x8xf32>
    %cst_19 = arith.constant dense<0.000000e+00> : vector<16x19xf32>
    %23 = tpu.matmul %22, %21, %cst_19 {dimension_numbers = #tpu.dot_dimension_numbers<[1], [0], [0], [1], [0, 0, 1, 1], [], []>} : vector<16x8xf32>, vector<8x19xf32>, vector<16x19xf32> -> vector<16x19xf32>
    %c0_20 = arith.constant 0 : index
    %c128_21 = arith.constant 128 : index
    %24 = vector.load %arg7[%c0_20, %c128_21] : memref<8x256xf32, #tpu.memory_space<vmem>>, vector<8x19xf32>
    %25 = vector.extract_strided_slice %20 {offsets = [0, 8], sizes = [16, 8], strides = [1, 1]} : vector<16x16xf32> to vector<16x8xf32>
    %cst_22 = arith.constant dense<0.000000e+00> : vector<16x19xf32>
    %26 = tpu.matmul %25, %24, %cst_22 {dimension_numbers = #tpu.dot_dimension_numbers<[1], [0], [0], [1], [0, 0, 1, 1], [], []>} : vector<16x8xf32>, vector<8x19xf32>, vector<16x19xf32> -> vector<16x19xf32>
    %27 = arith.addf %23, %26 : vector<16x19xf32>
    %c0_23 = arith.constant 0 : index
    %c0_24 = arith.constant 0 : index
    %28 = vector.load %arg5[%c0_23, %c0_24] : memref<16x1xf32, #tpu.memory_space<vmem>>, vector<16x1xf32>
    %29 = vector.broadcast %28 : vector<16x1xf32> to vector<16x19xf32>
    %30 = arith.addf %27, %29 : vector<16x19xf32>
    %cst_25 = arith.constant 0.000000e+00 : f32
    %31 = vector.broadcast %cst_25 : f32 to vector<16x19xf32>
    %32 = arith.maximumf %30, %31 : vector<16x19xf32>
    %c0_26 = arith.constant 0 : index
    %c0_27 = arith.constant 0 : index
    %c0_28 = arith.constant 0 : index
    %33 = vector.load %arg6[%c0_26, %c0_27, %c0_28] : memref<1x16x128xf32, #tpu.memory_space<vmem>>, vector<1x16x19xf32>
    %34 = vector.shape_cast %33 : vector<1x16x19xf32> to vector<16x19xf32>
    %35 = vector.shape_cast %32 : vector<16x19xf32> to vector<1x16x19xf32>
    tpu.vector_store %arg6[%c0_26, %c0_27, %c0_28], %35 {strides = array<i32>} : memref<1x16x128xf32, #tpu.memory_space<vmem>>, vector<1x16x19xf32>,
    return
  }
  func.func @transform_0(%arg0: i32) -> (i32, i32, i32) {
    %c0_i32 = arith.constant 0 : i32
    %c0_i32_0 = arith.constant 0 : i32
    %c0_i32_1 = arith.constant 0 : i32
    return %arg0, %c0_i32, %c0_i32_0 : i32, i32, i32
  }
  func.func @transform_1(%arg0: i32) -> (i32, i32) {
    %c0_i32 = arith.constant 0 : i32
    %c0_i32_0 = arith.constant 0 : i32
    %c0_i32_1 = arith.constant 0 : i32
    return %c0_i32, %c0_i32_0 : i32, i32
  }
  func.func @transform_2(%arg0: i32) -> (i32, i32) {
    %c0_i32 = arith.constant 0 : i32
    %c0_i32_0 = arith.constant 0 : i32
    %c0_i32_1 = arith.constant 0 : i32
    return %c0_i32, %c0_i32_0 : i32, i32
  }
  func.func @transform_3(%arg0: i32) -> (i32, i32) {
    %c0_i32 = arith.constant 0 : i32
    %c0_i32_0 = arith.constant 0 : i32
    %c0_i32_1 = arith.constant 0 : i32
    return %c0_i32, %c0_i32_0 : i32, i32
  }
  func.func @transform_4(%arg0: i32) -> (i32, i32) {
    %c0_i32 = arith.constant 0 : i32
    %c0_i32_0 = arith.constant 0 : i32
    %c0_i32_1 = arith.constant 0 : i32
    return %c0_i32, %c0_i32_0 : i32, i32
  }
  func.func @transform_5(%arg0: i32) -> (i32, i32, i32) {
    %c0_i32 = arith.constant 0 : i32
    %c0_i32_0 = arith.constant 0 : i32
    %c0_i32_1 = arith.constant 0 : i32
    return %arg0, %c0_i32, %c0_i32_0 : i32, i32, i32
  }
}

</mosaic_0001>

<bundles_post_ra>
// kernel: tpu_custom_call.1
= control target key start
LH: loop header
LB: loop body
LE: loop exit
PB: predicated region body
PF: predicated region fallthrough
CT: control target
= control target key end

     0   :  { %10 = vsyncpa [#allocation5], 0  ;;  %s823_s0 = inlined_call_operand.vmem [shape: f32[2,8,128], index: 0, kind: input, shape index: {}]   ;;  %s824_s1 = inlined_call_operand.vmem [shape: f32[8,16], index: 1, kind: input, shape index: {}]   ;;  %s825_s2 = inlined_call_operand.hbm [shape: f32[16,16], index: 2, kind: input, shape index: {}]   ;;  %s826_s3 = inlined_call_operand.vmem [shape: f32[8,1], index: 3, kind: input, shape index: {}]   ;;  %s827_s4 = inlined_call_operand.vmem [shape: f32[16,1], index: 4, kind: input, shape index: {}]   ;;  %s828_s5 = inlined_call_operand.hbm [shape: f32[2,16,128], index: 5, kind: output, shape index: {}]  }
   0x1   :  { %11 = vsyncpa [#allocation6], 0 }
   0x2   :  { %13 = vsyncpa [#allocation6 + $0x1], 0  ;;  %s710_s18 = smov 0   ;;  %s712_s19 = smov 0  }
   0x3   :  { %s714_s20 = smov 0   ;;  %s716_s21 = smov 0  }
   0x4 LB: > { %s731_s22 = sadd.s32 4294967295, %s668_s21   ;;  %s486_s23 = sadd.s32 4294967294, %s668_s21   ;;  %s668_s21 = sphi %s716_s21, %s834_s21   ;;  %s664_s20 = sphi %s714_s20, %s833_s20   ;;  %s660_s19 = sphi %s712_s19, %s832_s19   ;;  %s656_s18 = sphi %s710_s18, %s831_s18  }
   0x5   : > { %s735_s24 = sadd.s32 1, %s668_s21   ;;  %s136_s25 = sadd.s32 1, %s664_s20 }
   0x6   : > { %s133_s26 = ssub.s32 %s668_s21, %s735_s24  ;;  %p146_p0 = scmp.ne.s32.totalorder %s664_s20, %s660_s19 }
   0x7   : > { %p134_p1 = scmp.eq.s32.totalorder %s133_s26, 0  ;;  %p147_p2 = scmp.eq.s32.totalorder %s731_s22, 1 }
   0x8   : > { %p152_p3 = scmp.ne.s32.totalorder %s660_s19, %s656_s18  ;;  %p153_p4 = scmp.eq.s32.totalorder %s486_s23, 1 }
   0x9   : > { %s746_s27 = scalar_select %p134_p1, %s664_s20, %s136_s25  }
   0xa   : > { %p748_p5 = por %p147_p2, %p146_p0  ;;  %p752_p6 = por %p153_p4, %p152_p3 }
   0xb   : > { %p487_p7 = scmp.ge.s32.totalorder %s668_s21, 1  ;;  %p160_p8 = scmp.lt.s32.totalorder %s668_s21, 3 }
   0xc   : > { %p520_p9 = scmp.eq.s32.totalorder %s731_s22, 0  ;;  %s174_s7 = sshll.u32 %s825_s2, 4  ;;  %s175_s7 = int_to_ptr.hbm [resolvable:$true] %s174_s7 }
   0xd   : > { %p161_p10 = pnand %p487_p7, %p160_p8  ;;  %s670_s8 = smov [#allocation4]  }
   0xe   : > { %s176_s9 = sshll.u32 %s670_s8, 4  ;;  %s671_s10 = smov 128   ;;  %s177_s9 = int_to_ptr.vmem [resolvable:$true] %s176_s9 }
   0xf   : > { %p512_p11 = pneg %p161_p10  ;;  %s672_s11 = smov 8  }
  0x10   : > { %205 = sbr.rel (%p161_p10) target bundleno = 563 (0x233), region = 40 }
  0x11   : > { %p513_p12 = pnand %p520_p9, %p512_p11 }
  0x13   : > { %515 = dma.hbm_to_vmem [thread:$0]  (!%p513_p12), %s175_s7, 256, %s177_s9, [#allocation5], %s671_s10, %s671_s10, %s672_s11  }
  0x15   : > { %647 = dma.done.wait (%p520_p9), [#allocation5], 256  }
  0x16   : > { %649 = vsyncadd (%p520_p9), [#allocation5], 4294967040  ;;  %p233_p13 = scmp.lt.s32.totalorder %s731_s22, 1  ;;  %s673_s17 = smov 127   ;;  %v237_v1 = vld [vmem:[%s824_s1] sm:$0xff]  ;;  %vm246_vm0 = vcmask 64512  }
  0x17   : > { %s674_s26 = smov 120   ;;  %v291_v2 = vld [vmem:[%s826_s3] sm:$0xff]  ;;  %v675_v3 = vmov 0   ;;  %vm300_vm1 = vcmask 154760   ;;  %v676_v6 = vmov 0.0   ;;  %v304_v7 = vld [vmem:[#allocation4] sm:$0xff] }
  0x18   : > { %s234_s12 = scalar_select %p233_p13, %s731_s22, 1  ;;  %565 = vset.pattern.permute.xlu1 %v675_v3  ;;  %571 = vset.pattern.permute.xlu0 %v675_v3  ;;  %301 = vst.msk [vmem:[#allocation2 + $0x8] sm:$0xff] %vm300_vm1, %v676_v6  ;;  %v305_v9 = vld [vmem:[#allocation4 + $0x8] sm:$0xff]  ;;  %vm302_vm2 = vcmask 138240   ;;  %v378_v17 = vld [vmem:[%s827_s4 + $0x8] sm:$0xff]  ;;  %v377_v20 = vld [vmem:[%s827_s4] sm:$0xff] }
  0x19   : > { %294 = vperm.xlu1 %565, %v291_v2   ;;  %310 = vrot.lane.b32.xlu2 %v304_v7, %s674_s26  ;;  %s677_s7 = smov 2   ;;  %vm347_vm3 = vcmask 15360   ;;  %s505_s14 = sshll.u32 %s731_s22, 4  ;;  %vm393_vm4 = vcmask 154624  }
  0x1a   : > { %s493_s13 = sshll.u32 %s234_s12, 3  ;;  %s230_s12 = sand.u32 1, %s660_s19  }
  0x1b   : > { %s236_s16 = scalar_lea.vmem %s823_s0, %s493_s13  ;;  %s492_s13 = sshll.u32 %s230_s12, 4 }
  0x1c   : > { %v238_v0 = vld [vmem:[%s236_s16] sm:$0xff]  ;;  %s232_s23 = scalar_lea.vmem [#allocation7], %s492_s13  ;;  %s397_s22 = scalar_lea.sflag [#allocation6], %s230_s12 }
  0x1d   : > { %243 = vrot.lane.b32.xlu0 %v238_v0, %s673_s17  ;;  %286 = vmatpush.msra.mxu1 %v238_v0  ;;  %s408_s17 = scalar_lea.hbm %s828_s5, %s505_s14  ;;  %s409_s25 = sshll.u32 %s232_s23, 4  ;;  %s410_s25 = int_to_ptr.vmem [resolvable:$true] %s409_s25 }
  0x1e   : > { %495 = vmatmul.msk.f32.vlgmr.msra.gmra.mxu1 %vm246_vm0, %v237_v1  ;;  %s622_s9 = scalar_lea.hbm %s828_s5, 32 }
  0x21   : > { %312 = vrot.lane.b32.xlu2 %v305_v9, %s674_s26 }
  0x25   : > { %240 = vrot.lane.b32.xlu0 %v237_v1, %s674_s26  ;;  %s411_s26 = sshll.u32 %s408_s17, 4  ;;  %s412_s26 = int_to_ptr.hbm [resolvable:$true] %s411_s26 }
  0x26   : > { %s616_s30 = sshra.s32 %s412_s26, 4  ;;  %s617_s30 = int_to_ptr.hbm [resolvable:$true] %s616_s30 }
  0x27   : > { %s618_s6 = scalar_lea.hbm %s617_s30, 16  ;;  %p623_p3 = scmp.lt.s32.totalorder %s617_s30, %s828_s5 }
  0x28   : > { %p619_p0 = scmp.ne.s32.totalorder %s617_s30, %s618_s6  ;;  %p624_p4 = scmp.lt.s32.totalorder %s622_s9, %s618_s6 }
  0x2a   : > { %p620_p1 = pnand %p619_p0, %p748_p5  ;;  %p625_p7 = por %p624_p4, %p623_p3 }
  0x2c   : > { %p621_p2 = pneg %p620_p1 }
  0x2d   : > { %381 = vperm.xlu0 %571, %v377_v20  }
  0x2e   : > { %p626_p8 = pnand %p625_p7, %p621_p2 }
  0x73   : > { %v311_v18 = vpop.permute.xlu2 %310 }
  0x7b   : > { %v313_v19 = vpop.permute.xlu2 %312 }
  0x8b   : > { %v295_v11 = vpop.permute.xlu1 %294 }
  0x8f   : > { %v244_v4 = vpop.permute.xlu0 %243 }
  0x90   : > { %264 = vmatpush.msra.mxu0 %v244_v4 }
  0x97   : > { %v241_v5 = vpop.permute.xlu0 %240 }
  0x98   : > { %494 = vmatmul.msk.f32.vlgmr.msra.gmra.mxu0 %vm246_vm0, %v241_v5 }
  0x9b   : > { %v288_v8 = vpop.f32.mrf.mxu1 }
  0x9f   : > { %v382_v27 = vpop.permute.xlu0 %381 }
 0x115   : > { %v266_v10 = vpop.f32.mrf.mxu0 }
 0x116   : > { %v289_v12 = vadd.f32 %v288_v8, %v266_v10 }
 0x118   : > { %v297_v13 = vadd.f32 %v295_v11, %v289_v12 }
 0x11a   : > { %v298_v14 = vmax.f32 %v297_v13, 0.0 }
 0x11c   : > { %303 = vst.msk [vmem:[#allocation2 + $0x8] sm:$0xff] %vm302_vm2, %v298_v14 }
 0x123   : > { %v307_v15 = vld [vmem:[#allocation2 + $0x8] sm:$0xff] }
 0x124   : > { %v566_v16 = vpack.i.bf16 %v307_v15, %v676_v6  ;;  %333 = vmatpush.msra.mxu2 %v307_v15 }
 0x125   : > { %496 = vmatmul.msk.f32.vlgmr.msra.gmra.mxu2 %vm246_vm0, %v311_v18 }
 0x126   : > { %567 = vrot.lane.b32.xlu1 %v566_v16, %s677_s7 }
 0x12d   : > { %497 = vmatmul.msk.f32.gmra.mxu2 %vm246_vm0, %v313_v19 }
 0x12e   : > { %386 = vperm.xlu1 %565, %v378_v17  }
 0x198   : > { %v568_v21 = vpop.permute.xlu1 %567 }
 0x199   : > { %v570_v22 = vunpack.i.h.bf16 %v568_v21  ;;  %v569_v23 = vunpack.i.l.bf16 %v568_v21 }
 0x19b   : > { %v348_v24 = vsel %vm347_vm3, %v569_v23, %v570_v22 }
 0x19c   : > { %369 = vmatpush.msra.mxu3 %v348_v24 }
 0x19d   : > { %498 = vmatmul.msk.f32.vlgmr.msra.gmra.mxu3 %vm246_vm0, %v304_v7 }
 0x1a0   : > { %v387_v34 = vpop.permute.xlu1 %386 }
 0x1a5   : > { %499 = vmatmul.msk.f32.gmra.mxu3 %vm246_vm0, %v305_v9 }
 0x1a8   : > { %v335_v25 = vpop.f32.mrf.mxu2 }
 0x1b0   : > { %v338_v31 = vpop.f32.mrf.mxu2 }
 0x220   : > { %v371_v26 = vpop.f32.mrf.mxu3 }
 0x221   : > { %v372_v28 = vadd.f32 %v371_v26, %v335_v25 }
 0x223   : > { %v389_v29 = vadd.f32 %v382_v27, %v372_v28 }
 0x225   : > { %v391_v30 = vmax.f32 %v389_v29, 0.0 }
 0x227   : > { %394 = vst.msk [vmem:[%s232_s23] sm:$0xff] %vm393_vm4, %v391_v30 }
 0x228   : > { %v374_v32 = vpop.f32.mrf.mxu3 }
 0x229   : > { %v375_v33 = vadd.f32 %v374_v32, %v338_v31 }
 0x22b   : > { %v390_v35 = vadd.f32 %v387_v34, %v375_v33 }
 0x22d   : > { %v392_v36 = vmax.f32 %v390_v35, 0.0 }
 0x22f   : > { %395 = vst.msk [vmem:[%s232_s23 + $0x8] sm:$0xff] %vm393_vm4, %v392_v36 }
 0x230   : > { %629 = shalt.err (!%p626_p8)
}
 0x231   : > { %s678_s12 = smov 128   ;;  %s679_s13 = smov 8  }
 0x232   : > { %510 = dma.vmem_to_hbm [thread:$0]  (%p748_p5), %s410_s25, 256, %s412_s26, %s397_s22, %s678_s12, %s678_s12, %s679_s13  }
 0x233 PF: > { %p522_p9 = scmp.ge.s32.totalorder %s668_s21, 2  ;;  %s426_s14 = sand.u32 1, %s656_s18  }
 0x234   : > { %s427_s15 = scalar_lea.sflag [#allocation6], %s426_s14 }
 0x235   : > { %p517_p10 = pnand %p522_p9, %p752_p6 }
 0x237   : > { %p518_p11 = pneg %p517_p10 }
 0x239   : > { %651 = dma.done.wait (%p518_p11), %s427_s15, 256  }
 0x23a   : > { %653 = vsyncadd (%p518_p11), %s427_s15, 4294967040  ;;  %p16_p12 = scmp.ge.s32.totalorder %s735_s24, 4   ;;  %s831_s18 = smov %s660_s19 }
 0x23b   : > { %s832_s19 = smov %s664_s20  ;;  %s833_s20 = smov %s746_s27 }
 0x23c   : > { %s834_s21 = smov %s735_s24  ;;  %18 = sbr.rel (!%p16_p12) target bundleno = 4 (0x4), region = 80 }
 0x241   :  { %433 = vsyncpa [#allocation5], 1 }
 0x242   :  { %435 = vsyncpa [#allocation5 + $0x1], 1 }
 0x243   :  { %436 = vsyncpa [#allocation6], 1 }
 0x244   :  { %438 = vsyncpa [#allocation6 + $0x1], 1 }

</bundles_post_ra>
